<compile_context>
chip_gen: v7x
topology: tpu7x:2x2x1
jax: 0.10.0
libtpu: 0.0.40
codegen_flags: <defaults>
</compile_context>

<pallas_src>
import functools

import jax
import jax.numpy as jnp
from jax.experimental import pallas as pl
from jax.experimental.pallas import tpu as pltpu


def _feature_patch_mask_kernel(x_ref, m_ref, o_ref, pad_ref, *, ksize, scale):
    """One (batch, channel-tile) NCHW slab: separable box filter + masked blend.

    x_ref  : (1, TC, H, W) input tile (NCHW-native)
    m_ref  : (H, W) float32 per-pixel mask (1.0 = replace with local mean)
    o_ref  : (1, TC, H, W) output tile
    pad_ref: (TC, H+2r, W+2r) f32 zero-padded scratch (halo handles padding)
    """
    tc, hp, wp = pad_ref.shape
    r = (ksize - 1) // 2
    h = hp - 2 * r
    w = wp - 2 * r

    x = x_ref[0].astype(jnp.float32)                      # (TC, H, W)

    # Zero-padded scratch: halo stays zero, interior holds x.  One full store
    # + one interior store; every filter tap below is then a plain offset
    # slice + add (no per-tap zeros/concatenate temporaries).
    pad_ref[...] = jnp.zeros_like(pad_ref)
    pad_ref[:, r:r + h, r:r + w] = x

    # Row (H) pass: sublane-offset slices of the padded scratch, full padded
    # width so the zero side-columns ride along into the column pass.
    rsum = pad_ref[:, 0:h, :]                             # (TC, H, W+2r)
    for u in range(1, ksize):
        rsum = rsum + pad_ref[:, u:u + h, :]

    # Column (W) pass: lane-offset slices of rsum (its side columns are the
    # already-summed zero padding, so no edge handling is needed).
    # TODO(synk): for large mask_patch (many taps) move this pass onto the
    # idle MXU as a band-matrix contraction, or use a running sliding sum.
    csum = rsum[:, :, 0:w]                                # (TC, H, W)
    for v in range(1, ksize):
        csum = csum + rsum[:, :, v:v + w]

    # NOTE: edge pixels divide by K^2 (zero-padded mean) -- this intentionally
    # matches the PyTorch F.conv2d reference; do not "fix".
    pixel_mean = csum * (scale / float(ksize * ksize))

    # Masked blend: mask is exactly 0/1, so compare+select is an exact select
    # and the (H, W) mask broadcasts over the leading channel axis for free.
    m = m_ref[...]
    o_ref[0] = jnp.where(m != 0.0, pixel_mean, x).astype(o_ref.dtype)


def _pick_channel_tile(c, h, w):
    """Channel tile that divides C with a ~2 MiB padded-f32 block footprint.

    Live VMEM per grid step ~= 2x double-buffered input + 2x output + padded
    scratch + 2-3 f32 temporaries ~= 8 block-equivalents, so a 2 MiB block
    keeps the total ~16 MiB: safe on v7x (64 MiB physical) and leaves a lot of
    headroom on v5e/v6e (128 MiB)."""
    lanes = ((w + 127) // 128) * 128          # lane padding of the last dim
    subl = ((h + 7) // 8) * 8                 # sublane padding
    per_channel_bytes = subl * lanes * 4      # f32 working set per channel
    budget_bytes = 2 * 1024 * 1024
    tc = max(1, budget_bytes // per_channel_bytes)
    tc = min(tc, c)
    while c % tc != 0:
        tc -= 1
    # TODO(synk): for very large H*W where even tc=1 exceeds the budget, the
    # spatial dims would also need tiling with halos; not needed here.
    return tc


def feature_patch_mask(x, key, *, mask_ratio=0.2, mask_patch=1, scale=1.0):
    """Pallas implementation of FeaturePatchMask.forward.

    Returns (masked_x : (B, C, H, W), mask : (ph, pw) float32).
    """
    b, c, h, w = x.shape
    assert h % mask_patch == 0 and w % mask_patch == 0, \
        "H and W must be multiples of mask_patch"
    ph, pw = h // mask_patch, w // mask_patch

    ksize = 3 * mask_patch
    # TODO(synk): even 3*mask_patch changes the conv output size in the PyTorch
    # reference (only odd kernels keep 'same' shape); only odd sizes supported.
    assert ksize % 2 == 1, "only odd 3*mask_patch supported"
    r = (ksize - 1) // 2

    # Random patch mask (torch.rand(ph, pw) < mask_ratio), deterministic key.
    mask = jax.random.uniform(key, (ph, pw)) < mask_ratio
    # Compact per-pixel mask (H, W) -- no trailing size-1 lane dim.
    pixel_mask = jnp.repeat(jnp.repeat(mask, mask_patch, axis=0),
                            mask_patch, axis=1).astype(jnp.float32)

    tc = _pick_channel_tile(c, h, w)
    grid = (b, c // tc)

    kernel = functools.partial(_feature_patch_mask_kernel,
                               ksize=ksize, scale=float(scale))

    out = pl.pallas_call(
        kernel,
        out_shape=jax.ShapeDtypeStruct((b, c, h, w), x.dtype),
        grid_spec=pltpu.PrefetchScalarGridSpec(
            num_scalar_prefetch=0,
            grid=grid,
            in_specs=[
                pl.BlockSpec((1, tc, h, w), lambda i, j: (i, j, 0, 0)),
                pl.BlockSpec((h, w), lambda i, j: (0, 0)),   # resident mask
            ],
            out_specs=pl.BlockSpec((1, tc, h, w), lambda i, j: (i, j, 0, 0)),
            scratch_shapes=[
                pltpu.VMEM((tc, h + 2 * r, w + 2 * r), jnp.float32),
            ],
        ),
        compiler_params=pltpu.CompilerParams(
            dimension_semantics=("parallel", "parallel"),
            vmem_limit_bytes=48 * 1024 * 1024),
    )(x, pixel_mask)

    # torch: mask_index * torch.ones(1) -> float32 (ph, pw)
    return out, mask.astype(jnp.float32)


def _reference(x, pixel_mask, ksize, scale):
    """Pure-JAX reference (same math, no Pallas) for validation."""
    b, c, h, w = x.shape
    r = (ksize - 1) // 2
    xp = jnp.pad(x.astype(jnp.float32), ((0, 0), (0, 0), (r, r), (r, r)))
    acc = jnp.zeros((b, c, h, w), jnp.float32)
    for u in range(ksize):
        for v in range(ksize):
            acc = acc + xp[:, :, u:u + h, v:v + w]
    mean = acc * (scale / float(ksize * ksize))
    m = (pixel_mask > 0.5)[None, None, :, :]
    return jnp.where(m, mean, x.astype(jnp.float32)).astype(x.dtype)


if __name__ == "__main__":
    key = jax.random.PRNGKey(0)
    k_x, k_mask, k_x2, k_x3, k_m3 = jax.random.split(key, 5)

    # Test 1: module defaults, small NCHW input.
    B, C, H, W = 2, 4, 16, 16
    x = jax.random.normal(k_x, (B, C, H, W), dtype=jnp.float32)
    out, mask = feature_patch_mask(x, k_mask, mask_ratio=0.2,
                                   mask_patch=1, scale=1.0)
    out = jax.block_until_ready(out)
    mask = jax.block_until_ready(mask)
    assert out.shape == (B, C, H, W)
    assert mask.shape == (H, W)                 # mask_patch=1 -> per-pixel mask
    ref = _reference(x, mask, ksize=3, scale=1.0)
    assert jnp.allclose(out, ref, atol=1e-5, rtol=1e-5)

    # Test 2: larger channel count (multi-channel tile) + non-default scale/ratio.
    x2 = jax.random.normal(k_x2, (2, 128, 16, 16), dtype=jnp.float32)
    out2, mask2 = feature_patch_mask(x2, k_mask, mask_ratio=0.5,
                                     mask_patch=1, scale=0.5)
    out2 = jax.block_until_ready(out2)
    ref2 = _reference(x2, mask2, ksize=3, scale=0.5)
    assert jnp.allclose(out2, ref2, atol=1e-5, rtol=1e-5)

    # Test 3: mask_patch=3 (ksize=9) exercises patch expansion + larger halo.
    x3 = jax.random.normal(k_x3, (1, 4, 18, 18), dtype=jnp.float32)
    out3, mask3 = feature_patch_mask(x3, k_m3, mask_ratio=0.4,
                                     mask_patch=3, scale=1.0)
    out3 = jax.block_until_ready(out3)
    assert mask3.shape == (6, 6)
    pm3 = jnp.repeat(jnp.repeat(mask3, 3, axis=0), 3, axis=1)
    ref3 = _reference(x3, pm3, ksize=9, scale=1.0)
    assert jnp.allclose(out3, ref3, atol=1e-5, rtol=1e-5)

    print("KERNEL_OK")
</pallas_src>

<mosaic_0001>
module attributes {stable_mosaic.version = 11 : i64} {
  func.func @_feature_patch_mask_kernel(%arg0: i32, %arg1: i32, %arg2: memref<1x4x16x16xf32, #tpu.memory_space<vmem>>, %arg3: memref<16x16xf32, #tpu.memory_space<vmem>>, %arg4: memref<1x4x16x16xf32, #tpu.memory_space<vmem>>, %arg5: memref<4x18x18xf32, #tpu.memory_space<vmem>>) attributes {dimension_semantics = [#tpu.dimension_semantics<parallel>, #tpu.dimension_semantics<parallel>], iteration_bounds = array<i64: 2, 1>, scalar_prefetch = 0 : i64, scratch_operands = 1 : i64, tpu.core_type = #tpu.core_type<tc>, window_params = [{transform_indices = @transform_0, window_bounds = array<i64: 1, 4, 16, 16>}, {pipeline_mode = #tpu.pipeline_mode<synchronous>, transform_indices = @transform_1, window_bounds = array<i64: 16, 16>}, {transform_indices = @transform_2, window_bounds = array<i64: 1, 4, 16, 16>}]} {
    %c0 = arith.constant 0 : index
    %c0_0 = arith.constant 0 : index
    %c0_1 = arith.constant 0 : index
    %c0_2 = arith.constant 0 : index
    %0 = vector.load %arg2[%c0, %c0_0, %c0_1, %c0_2] : memref<1x4x16x16xf32, #tpu.memory_space<vmem>>, vector<1x4x16x16xf32>
    %1 = vector.shape_cast %0 : vector<1x4x16x16xf32> to vector<4x16x16xf32>
    %cst = arith.constant 0.000000e+00 : f32
    %2 = vector.broadcast %cst : f32 to vector<4x18x18xf32>
    %c0_3 = arith.constant 0 : index
    %c0_4 = arith.constant 0 : index
    %c0_5 = arith.constant 0 : index
    %3 = vector.load %arg5[%c0_3, %c0_4, %c0_5] : memref<4x18x18xf32, #tpu.memory_space<vmem>>, vector<4x18x18xf32>
    tpu.vector_store %arg5[%c0_3, %c0_4, %c0_5], %2 {strides = array<i32>} : memref<4x18x18xf32, #tpu.memory_space<vmem>>, vector<4x18x18xf32>,
    %c0_6 = arith.constant 0 : index
    %c1 = arith.constant 1 : index
    %c1_7 = arith.constant 1 : index
    %4 = vector.load %arg5[%c0_6, %c1, %c1_7] : memref<4x18x18xf32, #tpu.memory_space<vmem>>, vector<4x16x16xf32>
    tpu.vector_store %arg5[%c0_6, %c1, %c1_7], %1 {strides = array<i32>} : memref<4x18x18xf32, #tpu.memory_space<vmem>>, vector<4x16x16xf32>,
    %c0_8 = arith.constant 0 : index
    %c0_9 = arith.constant 0 : index
    %c0_10 = arith.constant 0 : index
    %5 = vector.load %arg5[%c0_8, %c0_9, %c0_10] : memref<4x18x18xf32, #tpu.memory_space<vmem>>, vector<4x16x18xf32>
    %c0_11 = arith.constant 0 : index
    %c1_12 = arith.constant 1 : index
    %c0_13 = arith.constant 0 : index
    %6 = vector.load %arg5[%c0_11, %c1_12, %c0_13] : memref<4x18x18xf32, #tpu.memory_space<vmem>>, vector<4x16x18xf32>
    %7 = arith.addf %5, %6 : vector<4x16x18xf32>
    %c0_14 = arith.constant 0 : index
    %c2 = arith.constant 2 : index
    %c0_15 = arith.constant 0 : index
    %8 = vector.load %arg5[%c0_14, %c2, %c0_15] : memref<4x18x18xf32, #tpu.memory_space<vmem>>, vector<4x16x18xf32>
    %9 = arith.addf %7, %8 : vector<4x16x18xf32>
    %10 = vector.extract_strided_slice %9 {offsets = [0, 0, 0], sizes = [4, 16, 16], strides = [1, 1, 1]} : vector<4x16x18xf32> to vector<4x16x16xf32>
    %11 = vector.extract_strided_slice %9 {offsets = [0, 0, 1], sizes = [4, 16, 16], strides = [1, 1, 1]} : vector<4x16x18xf32> to vector<4x16x16xf32>
    %12 = arith.addf %10, %11 : vector<4x16x16xf32>
    %13 = vector.extract_strided_slice %9 {offsets = [0, 0, 2], sizes = [4, 16, 16], strides = [1, 1, 1]} : vector<4x16x18xf32> to vector<4x16x16xf32>
    %14 = arith.addf %12, %13 : vector<4x16x16xf32>
    %cst_16 = arith.constant 0.111111112 : f32
    %15 = vector.broadcast %cst_16 : f32 to vector<4x16x16xf32>
    %16 = arith.mulf %14, %15 : vector<4x16x16xf32>
    %c0_17 = arith.constant 0 : index
    %c0_18 = arith.constant 0 : index
    %17 = vector.load %arg3[%c0_17, %c0_18] : memref<16x16xf32, #tpu.memory_space<vmem>>, vector<16x16xf32>
    %cst_19 = arith.constant 0.000000e+00 : f32
    %18 = vector.broadcast %cst_19 : f32 to vector<16x16xf32>
    %19 = arith.cmpf one, %17, %18 : vector<16x16xf32>
    %20 = vector.shape_cast %19 : vector<16x16xi1> to vector<1x16x16xi1>
    %21 = vector.broadcast %20 : vector<1x16x16xi1> to vector<4x16x16xi1>
    %22 = arith.select %21, %16, %1 : vector<4x16x16xi1>, vector<4x16x16xf32>
    %c0_20 = arith.constant 0 : index
    %c0_21 = arith.constant 0 : index
    %c0_22 = arith.constant 0 : index
    %c0_23 = arith.constant 0 : index
    %23 = vector.load %arg4[%c0_20, %c0_21, %c0_22, %c0_23] : memref<1x4x16x16xf32, #tpu.memory_space<vmem>>, vector<1x4x16x16xf32>
    %24 = vector.shape_cast %23 : vector<1x4x16x16xf32> to vector<4x16x16xf32>
    %25 = vector.shape_cast %22 : vector<4x16x16xf32> to vector<1x4x16x16xf32>
    tpu.vector_store %arg4[%c0_20, %c0_21, %c0_22, %c0_23], %25 {strides = array<i32>} : memref<1x4x16x16xf32, #tpu.memory_space<vmem>>, vector<1x4x16x16xf32>,
    return
  }
  func.func @transform_0(%arg0: i32, %arg1: i32) -> (i32, i32, i32, i32) {
    %c0_i32 = arith.constant 0 : i32
    %c0_i32_0 = arith.constant 0 : i32
    %c0_i32_1 = arith.constant 0 : i32
    return %arg0, %arg1, %c0_i32, %c0_i32_0 : i32, i32, i32, i32
  }
  func.func @transform_1(%arg0: i32, %arg1: i32) -> (i32, i32) {
    %c0_i32 = arith.constant 0 : i32
    %c0_i32_0 = arith.constant 0 : i32
    %c0_i32_1 = arith.constant 0 : i32
    return %c0_i32, %c0_i32_0 : i32, i32
  }
  func.func @transform_2(%arg0: i32, %arg1: i32) -> (i32, i32, i32, i32) {
    %c0_i32 = arith.constant 0 : i32
    %c0_i32_0 = arith.constant 0 : i32
    %c0_i32_1 = arith.constant 0 : i32
    return %arg0, %arg1, %c0_i32, %c0_i32_0 : i32, i32, i32, i32
  }
}

</mosaic_0001>

<bundles_post_ra>
// kernel: tpu_custom_call.1
= control target key start
LH: loop header
LB: loop body
LE: loop exit
PB: predicated region body
PF: predicated region fallthrough
CT: control target
= control target key end

     0   :  { %7 = vsyncpa [#allocation4], 0  ;;  %s1106_s0 = inlined_call_operand.hbm [shape: f32[2,4,16,16], index: 0, kind: input, shape index: {}]   ;;  %s1107_s1 = inlined_call_operand.hbm [shape: f32[16,16], index: 1, kind: input, shape index: {}]   ;;  %s1108_s2 = inlined_call_operand.hbm [shape: f32[2,4,16,16], index: 2, kind: output, shape index: {}]  }
   0x1   :  { %9 = vsyncpa [#allocation4 + $0x1], 0 }
   0x2   :  { %10 = vsyncpa [#allocation7], 0 }
   0x3   :  { %11 = vsyncpa [#allocation5], 0 }
   0x4   :  { %13 = vsyncpa [#allocation5 + $0x1], 0  ;;  %s792_s9 = smov 0   ;;  %s794_s10 = smov 0  }
   0x5   :  { %s796_s11 = smov 0   ;;  %s798_s12 = smov 0  }
   0x6   :  { %s800_s13 = smov 0   ;;  %s802_s14 = smov 0  }
   0x7 LB: > { %s520_s15 = sadd.s32 4294967295, %s764_s14   ;;  %s521_s16 = sadd.s32 4294967294, %s764_s14   ;;  %s764_s14 = sphi %s802_s14, %s19_s14   ;;  %s760_s13 = sphi %s800_s13, %s1132_s13   ;;  %s756_s12 = sphi %s798_s12, %s1131_s12   ;;  %s752_s11 = sphi %s796_s11, %s1130_s11   ;;  %s748_s10 = sphi %s794_s10, %s1129_s10   ;;  %s744_s9 = sphi %s792_s9, %s1128_s9  }
   0x8   : > { %p53_p0 = scmp.ne.s32.totalorder %s748_s10, %s744_s9  ;;  %p826_p1 = scmp.eq.s32.totalorder %s520_s15, 0 }
   0x9   : > { %p830_p2 = scmp.eq.s32.totalorder %s520_s15, 1  ;;  %p106_p3 = scmp.eq.s32.totalorder %s521_s16, 1 }
   0xa   : > { %s1113_s17 = scalar_select %p826_p1, 1, 0 }
   0xb   : > { %s1114_s18 = scalar_select %p830_p2, 1, 0 }
   0xc   : > { %p836_p4 = por %p826_p1, %p53_p0  ;;  %p522_p5 = scmp.ge.s32.totalorder %s764_s14, 1 }
   0xd   : > { %p841_p6 = por %p106_p3, %p53_p0  ;;  %p113_p7 = scmp.lt.s32.totalorder %s764_s14, 3 }
   0xe   : > { %s1115_s19 = scalar_select %p836_p4, 1, 0 }
   0xf   : > { %s1116_s20 = scalar_select %p841_p6, 1, 0 }
  0x10   : > { %p846_p8 = pnand %p522_p5, %p113_p7  ;;  %s766_s22 = smov [#allocation6]  }
  0x11   : > { %s125_s23 = sshll.u32 %s766_s22, 4  ;;  %s31_s25 = sadd.s32 1, %s760_s13  ;;  %s126_s23 = int_to_ptr.vmem [resolvable:$true] %s125_s23 }
  0x12   : > { %s1117_s21 = scalar_select %p846_p8, 1, 0 }
  0x13   : > { %p547_p9 = pneg %p846_p8  ;;  %s620_s28 = scalar_lea.hbm %s1107_s1, 256 }
  0x14   : > { %p621_p12 = scmp.ne.s32.totalorder %s1107_s1, %s620_s28  ;;  %p627_p5 = scmp.lt.u32.totalorder %s620_s28, %s1107_s1 }
  0x15   : > { %p855_p11 = pnand %p547_p9, %p826_p1 }
  0x17   : > { %p622_p13 = pneg %p855_p11 }
  0x19   : > { %p623_p0 = pnand %p622_p13, %p621_p12 }
  0x1b   : > { %p624_p3 = pneg %p623_p0 }
  0x1d   : > { %p629_p7 = pnand %p627_p5, %p624_p3 }
  0x1f   : > { %632 = shalt.err (!%p629_p7)
}
  0x20   : > { %s633_s5 = scalar_lea.vmem %s126_s23, 256  ;;  %p641_p1 = scmp.lt.s32.totalorder %s126_s23, %s126_s23 }
  0x21   : > { %p634_p9 = scmp.ne.s32.totalorder %s126_s23, %s633_s5  ;;  %p642_p4 = scmp.lt.s32.totalorder %s633_s5, %s633_s5 }
  0x23   : > { %p636_p10 = pnand %p634_p9, %p622_p13  ;;  %p643_p8 = por %p642_p4, %p641_p1 }
  0x25   : > { %p637_p6 = pneg %p636_p10 }
  0x27   : > { %p644_p2 = pnand %p643_p8, %p637_p6 }
  0x29   : > { %647 = shalt.err (!%p644_p2)
}
  0x2a   : > { %s767_s6 = smov 128   ;;  %s768_s7 = smov 8  }
  0x2b   : > { %550 = dma.hbm_to_vmem [thread:$0]  (!%p855_p11), %s1107_s1, 256, %s126_s23, [#allocation7], %s767_s6, %s767_s6, %s768_s7  }
  0x2c   : > { %p33_p1 = scmp.ge.s32.totalorder %s31_s25, 2  ;;  %s40_s16 = sadd.s32 1, %s752_s11 }
  0x2d   : > { %p47_p2 = scmp.ne.s32.totalorder %s752_s11, %s748_s10  ;;  %p48_p4 = scmp.eq.s32.totalorder %s764_s14, 0 }
  0x2e   : > { %s1134_s25 = smov (%p33_p1, %s31_s25), 0  ;;  %p1120_p8 = scmp.ne.s32.totalorder %s1114_s18, 0 }
  0x2f   : > { %p885_p6 = por %p48_p4, %p47_p2  ;;  %s35_s26 = ssub.s32 %s760_s13, %s1134_s25 }
  0x30   : > { %p891_p10 = por %p1120_p8, %p47_p2  ;;  %p560_p12 = scmp.lt.s32.totalorder %s764_s14, 2 }
  0x31   : > { %p38_p11 = scmp.eq.s32.totalorder %s35_s26, 0  ;;  %s139_s23 = sand.u32 1, %s752_s11  }
  0x32   : > { %s525_s27 = sshll.u32 %s139_s23, 6  ;;  %s537_s29 = sshll.u32 %s760_s13, 10 }
  0x33   : > { %s900_s28 = scalar_select %p38_p11, %s752_s11, %s40_s16  }
  0x34   : > { %s906_s4 = scalar_lea.hbm %s1106_s0, %s537_s29  ;;  %s143_s18 = scalar_lea.vmem [#allocation3], %s525_s27 }
  0x35   : > { %s153_s5 = sshll.u32 %s143_s18, 4  ;;  %p912_p13 = pnand %p560_p12, %p885_p6  ;;  %s908_s5 = int_to_ptr.vmem [resolvable:$true] %s153_s5 }
  0x36   : > { %s916_s15 = scalar_lea.sflag [#allocation4], %s139_s23  ;;  %s648_s16 = scalar_lea.hbm %s906_s4, 1024 }
  0x37   : > { %p649_p0 = scmp.ne.s32.totalorder %s906_s4, %s648_s16  ;;  %p650_p3 = pneg %p912_p13 }
  0x38   : > { %s653_s22 = scalar_lea.hbm %s1106_s0, 2048  ;;  %p654_p9 = scmp.lt.u32.totalorder %s906_s4, %s1106_s0 }
  0x39   : > { %p651_p5 = pnand %p650_p3, %p649_p0  ;;  %p655_p1 = scmp.lt.u32.totalorder %s653_s22, %s648_s16 }
  0x3a   : > { %p657_p4 = scmp.lt.u32.totalorder %s648_s16, %s906_s4 }
  0x3b   : > { %p652_p7 = pneg %p651_p5  ;;  %p656_p2 = por %p655_p1, %p654_p9 }
  0x3d   : > { %p658_p6 = por %p657_p4, %p656_p2 }
  0x3f   : > { %p659_p8 = pnand %p658_p6, %p652_p7 }
  0x41   : > { %662 = shalt.err (!%p659_p8)
}
  0x42   : > { %s663_s23 = scalar_lea.vmem %s908_s5, 1024  ;;  %s769_s3 = smov [#allocation3]  }
  0x43   : > { %p664_p12 = scmp.ne.s32.totalorder %s908_s5, %s663_s23  ;;  %s668_s18 = sshll.u32 %s769_s3, 4  ;;  %s669_s18 = int_to_ptr.vmem [resolvable:$false] %s668_s18 }
  0x44   : > { %s670_s26 = scalar_lea.vmem %s669_s18, 2048  ;;  %p671_p5 = scmp.lt.s32.totalorder %s908_s5, %s669_s18 }
  0x45   : > { %p666_p11 = pnand %p664_p12, %p650_p3  ;;  %p672_p9 = scmp.lt.s32.totalorder %s670_s26, %s663_s23 }
  0x47   : > { %p667_p0 = pneg %p666_p11  ;;  %p673_p1 = por %p672_p9, %p671_p5 }
  0x49   : > { %p674_p2 = pnand %p673_p1, %p667_p0 }
  0x4b   : > { %677 = shalt.err (!%p674_p2)
}
  0x4c   : > { %554 = dma.hbm_to_vmem [thread:$0]  (!%p912_p13), %s906_s4, 1024, %s908_s5, %s916_s15, %s767_s6, %s767_s6, %s768_s7  }
  0x4d   : > { %p1123_p3 = scmp.ne.s32.totalorder %s1117_s21, 0 }
  0x4e   : > { %s950_s16 = sand.u32 (!%p1123_p3), 1, %s748_s10   ;;  %p1124_p7 = scmp.ne.s32.totalorder (!%p1123_p3), %s1115_s19, 0 }
  0x4f   : > { %165 = sbr.rel (%p1123_p3) target bundleno = 388 (0x184), region = 28  ;;  %s529_s27 = sshll.u32 (!%p1123_p3), %s950_s16, 6 }
  0x50   : > { %s168_s22 = scalar_lea.sflag (!%p1123_p3), [#allocation4], %s950_s16  ;;  %s956_s8 = scalar_lea.vmem (!%p1123_p3), [#allocation3], %s529_s27 }
  0x56   : > { %731 = dma.done.wait (%p1124_p7), %s168_s22, 1024  }
  0x57   : > { %733 = vsyncadd (%p1124_p7), %s168_s22, 4294966272  ;;  %p1125_p13 = scmp.ne.s32.totalorder %s1113_s17, 0 }
  0x59   : > { %735 = dma.done.wait (%p1125_p13), [#allocation7], 256  }
  0x5a   : > { %737 = vsyncadd (%p1125_p13), [#allocation7], 4294967040  ;;  %vm206_vm0 = vcmask 146432   ;;  %v770_v0 = vmov 0.0   ;;  %vm209_vm1 = vcmask 140288   ;;  %v967_v1 = vld [vmem:[%s956_s8 + $0x10] sm:$0xff] }
  0x5b   : > { %211 = vst.msk [vmem:[#allocation2 + $0x18] sm:$0xff] %vm206_vm0, %v770_v0  ;;  %212 = vst.msk [vmem:[#allocation2 + $0x20] sm:$0xff] %vm206_vm0, %v770_v0  ;;  %v970_v2 = vld [vmem:[%s956_s8] sm:$0xff]  ;;  %s771_s17 = smov 1   ;;  %v975_v3 = vld [vmem:[%s956_s8 + $0x18] sm:$0xff]  ;;  %vm252_vm2 = vcmask 138248  }
  0x5c   : > { %207 = vst.msk [vmem:[#allocation2] sm:$0xff] %vm206_vm0, %v770_v0  ;;  %208 = vst.msk [vmem:[#allocation2 + $0x8] sm:$0xff] %vm206_vm0, %v770_v0  ;;  %232 = vrot.lane.b32.xlu1 %v967_v1, %s771_s17  ;;  %228 = vrot.lane.b32.xlu0 %v970_v2, %s771_s17  ;;  %v978_v4 = vld [vmem:[%s956_s8 + $0x8] sm:$0xff]  ;;  %v986_v6 = vld [vmem:[%s956_s8 + $0x20] sm:$0xff]  ;;  %s772_s19 = smov 127   ;;  %s773_s21 = smov 126  }
  0x5d   : > { %214 = vst.msk [vmem:[#allocation2 + $0x30] sm:$0xff] %vm206_vm0, %v770_v0  ;;  %215 = vst.msk [vmem:[#allocation2 + $0x38] sm:$0xff] %vm206_vm0, %v770_v0  ;;  %v983_v5 = vld [vmem:[%s956_s8 + $0x28] sm:$0xff]  ;;  %v991_v7 = vld [vmem:[%s956_s8 + $0x38] sm:$0xff]  ;;  %vm397_vm4 = vcmask 130048   ;;  %s1018_s6 = scalar_lea.vmem [#allocation8], %s529_s27 }
  0x5e   : > { %217 = vst.msk [vmem:[#allocation2 + $0x48] sm:$0xff] %vm206_vm0, %v770_v0  ;;  %218 = vst.msk [vmem:[#allocation2 + $0x50] sm:$0xff] %vm206_vm0, %v770_v0  ;;  %v994_v8 = vld [vmem:[%s956_s8 + $0x30] sm:$0xff]  ;;  %s538_s7 = sshll.u32 %s756_s12, 10  ;;  %s423_s4 = sshll.u32 %s1018_s6, 4  ;;  %s1051_s4 = int_to_ptr.vmem [resolvable:$true] %s423_s4 }
  0x5f   : > { %213 = vst.msk [vmem:[#allocation2 + $0x28] sm:$0x3] %vm209_vm1, %v770_v0  ;;  %210 = vst.msk [vmem:[#allocation2 + $0x10] sm:$0x3] %vm209_vm1, %v770_v0  ;;  %s1049_s29 = scalar_lea.hbm %s1108_s2, %s538_s7  ;;  %s407_s12 = scalar_lea.sflag [#allocation5], %s950_s16 }
  0x60   : > { %216 = vst.msk [vmem:[#allocation2 + $0x40] sm:$0x3] %vm209_vm1, %v770_v0  ;;  %219 = vst.msk [vmem:[#allocation2 + $0x58] sm:$0x3] %vm209_vm1, %v770_v0  ;;  %234 = vrot.lane.b32.xlu1 %v975_v3, %s771_s17  ;;  %230 = vrot.lane.b32.xlu0 %v978_v4, %s771_s17  ;;  %s678_s30 = scalar_lea.vmem %s1051_s4, 1024  ;;  %s774_s23 = smov [#allocation8]  }
  0x61   : > { %p679_p4 = scmp.ne.s32.totalorder %s1051_s4, %s678_s30  ;;  %s682_s3 = sshll.u32 %s774_s23, 4  ;;  %s683_s3 = int_to_ptr.vmem [resolvable:$false] %s682_s3 }
  0x62   : > { %s684_s18 = scalar_lea.vmem %s683_s3, 2048  ;;  %p685_p12 = scmp.lt.s32.totalorder %s1051_s4, %s683_s3 }
  0x63   : > { %p680_p6 = pnand %p679_p4, %p891_p10  ;;  %p686_p11 = scmp.lt.s32.totalorder %s684_s18, %s678_s30 }
  0x64   : > { %238 = vrot.lane.b32.xlu1 %v983_v5, %s771_s17  ;;  %236 = vrot.lane.b32.xlu0 %v986_v6, %s771_s17 }
  0x65   : > { %p681_p8 = pneg %p680_p6  ;;  %p687_p0 = por %p686_p11, %p685_p12 }
  0x67   : > { %p688_p5 = pnand %p687_p0, %p681_p8 }
  0x68   : > { %242 = vrot.lane.b32.xlu1 %v991_v7, %s771_s17  ;;  %240 = vrot.lane.b32.xlu0 %v994_v8, %s771_s17 }
  0xce   : > { %v233_v9 = vpop.permute.xlu1 %232  ;;  %v229_v10 = vpop.permute.xlu0 %228 }
  0xcf   : > { %255 = vst.msk [vmem:[#allocation2 + $0x19] sm:$0xff] %vm252_vm2, %v233_v9  ;;  %253 = vst.msk [vmem:[#allocation2 + $0x1] sm:$0xff] %vm252_vm2, %v229_v10  ;;  %v381_v10 = vld [vmem:[#allocation6] sm:$0xff] }
  0xd0   : > { %vm383_vm3 = vcmp.ne.f32.partialorder %v381_v10, 0.0 }
  0xd2   : > { %v235_v11 = vpop.permute.xlu1 %234  ;;  %v231_v12 = vpop.permute.xlu0 %230 }
  0xd3   : > { %256 = vst.msk [vmem:[#allocation2 + $0x21] sm:$0xff] %vm252_vm2, %v235_v11  ;;  %254 = vst.msk [vmem:[#allocation2 + $0x9] sm:$0xff] %vm252_vm2, %v231_v12 }
  0xd6   : > { %v239_v13 = vpop.permute.xlu1 %238  ;;  %v237_v14 = vpop.permute.xlu0 %236  ;;  %v261_v15 = vld [vmem:[#allocation2] sm:$0xff]  ;;  %v263_v17 = vld [vmem:[#allocation2 + $0x18] sm:$0xff] }
  0xd7   : > { %v269_v16 = vld [vmem:[#allocation2 + $0x1] sm:$0xff]  ;;  %258 = vst.msk [vmem:[#allocation2 + $0x39] sm:$0xff] %vm252_vm2, %v239_v13  ;;  %257 = vst.msk [vmem:[#allocation2 + $0x31] sm:$0xff] %vm252_vm2, %v237_v14  ;;  %v271_v18 = vld [vmem:[#allocation2 + $0x19] sm:$0xff] }
  0xd8   : > { %v277_v19 = vadd.f32 %v269_v16, %v261_v15  ;;  %v279_v27 = vadd.f32 %v271_v18, %v263_v17  ;;  %v382_v14 = vld [vmem:[#allocation6 + $0x8] sm:$0xff] }
  0xd9   : > { %vm384_vm5 = vcmp.ne.f32.partialorder %v382_v14, 0.0 }
  0xda   : > { %v243_v20 = vpop.permute.xlu1 %242  ;;  %v241_v21 = vpop.permute.xlu0 %240  ;;  %v285_v22 = vld [vmem:[#allocation2 + $0x2] sm:$0xff]  ;;  %v286_v29 = vld [vmem:[#allocation2 + $0xa] sm:$0xff]  ;;  %v287_v30 = vld [vmem:[#allocation2 + $0x1a] sm:$0xff] }
  0xdb   : > { %v262_v23 = vld [vmem:[#allocation2 + $0x8] sm:$0xff]  ;;  %260 = vst.msk [vmem:[#allocation2 + $0x51] sm:$0xff] %vm252_vm2, %v243_v20  ;;  %259 = vst.msk [vmem:[#allocation2 + $0x49] sm:$0xff] %vm252_vm2, %v241_v21  ;;  %v293_v25 = vadd.f32 %v285_v22, %v277_v19  ;;  %v264_v28 = vld [vmem:[#allocation2 + $0x20] sm:$0xff]  ;;  %v295_v38 = vadd.f32 %v287_v30, %v279_v27 }
  0xdc   : > { %v270_v24 = vld [vmem:[#allocation2 + $0x9] sm:$0xff]  ;;  %v272_v31 = vld [vmem:[#allocation2 + $0x21] sm:$0xff] }
  0xdd   : > { %v278_v26 = vadd.f32 %v270_v24, %v262_v23  ;;  %309 = vrot.lane.b32.xlu0 %v293_v25, %s772_s19  ;;  %v280_v33 = vadd.f32 %v272_v31, %v264_v28  ;;  %v288_v34 = vld [vmem:[#allocation2 + $0x22] sm:$0xff] }
  0xde   : > { %v265_v35 = vld [vmem:[#allocation2 + $0x30] sm:$0xff]  ;;  %v266_v40 = vld [vmem:[#allocation2 + $0x38] sm:$0xff] }
  0xdf   : > { %v294_v32 = vadd.f32 %v286_v29, %v278_v26  ;;  %v273_v36 = vld [vmem:[#allocation2 + $0x31] sm:$0xff]  ;;  %v274_v41 = vld [vmem:[#allocation2 + $0x39] sm:$0xff]  ;;  %v296_v42 = vadd.f32 %v288_v34, %v280_v33 }
  0xe0   : > { %v289_v37 = vld [vmem:[#allocation2 + $0x32] sm:$0xff]  ;;  %v281_v39 = vadd.f32 %v273_v36, %v265_v35  ;;  %v282_v44 = vadd.f32 %v274_v41, %v266_v40  ;;  %v290_v45 = vld [vmem:[#allocation2 + $0x3a] sm:$0xff] }
  0xe1   : > { %311 = vrot.lane.b32.xlu1 %v294_v32, %s772_s19  ;;  %313 = vrot.lane.b32.xlu0 %v295_v38, %s772_s19 }
  0xe2   : > { %v297_v43 = vadd.f32 %v289_v37, %v281_v39  ;;  %v267_v46 = vld [vmem:[#allocation2 + $0x48] sm:$0xff]  ;;  %v268_v50 = vld [vmem:[#allocation2 + $0x50] sm:$0xff]  ;;  %v298_v52 = vadd.f32 %v290_v45, %v282_v44 }
  0xe3   : > { %v275_v47 = vld [vmem:[#allocation2 + $0x49] sm:$0xff]  ;;  %v276_v51 = vld [vmem:[#allocation2 + $0x51] sm:$0xff] }
  0xe4   : > { %v291_v48 = vld [vmem:[#allocation2 + $0x4a] sm:$0xff]  ;;  %v283_v49 = vadd.f32 %v275_v47, %v267_v46  ;;  %v284_v54 = vadd.f32 %v276_v51, %v268_v50  ;;  %v292_v55 = vld [vmem:[#allocation2 + $0x52] sm:$0xff] }
  0xe5   : > { %315 = vrot.lane.b32.xlu1 %v296_v42, %s772_s19  ;;  %317 = vrot.lane.b32.xlu0 %v297_v43, %s772_s19 }
  0xe6   : > { %v299_v53 = vadd.f32 %v291_v48, %v283_v49  ;;  %v300_v56 = vadd.f32 %v292_v55, %v284_v54 }
  0xe9   : > { %319 = vrot.lane.b32.xlu1 %v298_v52, %s772_s19  ;;  %321 = vrot.lane.b32.xlu0 %v299_v53, %s772_s19 }
  0xed   : > { %323 = vrot.lane.b32.xlu1 %v300_v56, %s772_s19  ;;  %341 = vrot.lane.b32.xlu0 %v293_v25, %s773_s21 }
  0xf1   : > { %343 = vrot.lane.b32.xlu1 %v294_v32, %s773_s21  ;;  %345 = vrot.lane.b32.xlu0 %v295_v38, %s773_s21 }
  0xf5   : > { %347 = vrot.lane.b32.xlu1 %v296_v42, %s773_s21  ;;  %349 = vrot.lane.b32.xlu0 %v297_v43, %s773_s21 }
  0xf9   : > { %351 = vrot.lane.b32.xlu1 %v298_v52, %s773_s21  ;;  %353 = vrot.lane.b32.xlu0 %v299_v53, %s773_s21 }
  0xfd   : > { %355 = vrot.lane.b32.xlu1 %v300_v56, %s773_s21 }
 0x14f   : > { %v310_v57 = vpop.permute.xlu0 %309 }
 0x150   : > { %v333_v9 = vadd.f32 %v310_v57, %v293_v25 }
 0x153   : > { %v312_v58 = vpop.permute.xlu1 %311  ;;  %v314_v59 = vpop.permute.xlu0 %313 }
 0x154   : > { %v334_v12 = vadd.f32 %v312_v58, %v294_v32  ;;  %v335_v16 = vadd.f32 %v314_v59, %v295_v38 }
 0x157   : > { %v316_v60 = vpop.permute.xlu1 %315  ;;  %v318_v61 = vpop.permute.xlu0 %317 }
 0x158   : > { %v336_v20 = vadd.f32 %v316_v60, %v296_v42  ;;  %v337_v25 = vadd.f32 %v318_v61, %v297_v43 }
 0x15b   : > { %v320_v62 = vpop.permute.xlu1 %319  ;;  %v322_v63 = vpop.permute.xlu0 %321 }
 0x15c   : > { %v338_v29 = vadd.f32 %v320_v62, %v298_v52  ;;  %v339_v34 = vadd.f32 %v322_v63, %v299_v53 }
 0x15f   : > { %v324_v0 = vpop.permute.xlu1 %323  ;;  %v342_v11 = vpop.permute.xlu0 %341 }
 0x160   : > { %v365_v13 = vadd.f32 %v342_v11, %v333_v9  ;;  %v340_v38 = vadd.f32 %v324_v0, %v300_v56 }
 0x162   : > { %v373_v17 = vmul.f32 0.11111111, %v365_v13 }
 0x163   : > { %v344_v15 = vpop.permute.xlu1 %343  ;;  %v346_v19 = vpop.permute.xlu0 %345 }
 0x164   : > { %v366_v18 = vadd.f32 %v344_v15, %v334_v12  ;;  %v389_v21 = vsel %vm383_vm3, %v373_v17, %v970_v2  ;;  %v367_v23 = vadd.f32 %v346_v19, %v335_v16 }
 0x165   : > { %398 = vst.msk [vmem:[%s1018_s6] sm:$0xff] %vm397_vm4, %v389_v21 }
 0x166   : > { %v374_v22 = vmul.f32 0.11111111, %v366_v18  ;;  %v375_v27 = vmul.f32 0.11111111, %v367_v23 }
 0x167   : > { %v348_v24 = vpop.permute.xlu1 %347  ;;  %v350_v2 = vpop.permute.xlu0 %349 }
 0x168   : > { %v390_v26 = vsel %vm384_vm5, %v374_v22, %v978_v4  ;;  %v368_v28 = vadd.f32 %v348_v24, %v336_v20  ;;  %v391_v30 = vsel %vm383_vm3, %v375_v27, %v967_v1  ;;  %v369_v32 = vadd.f32 %v350_v2, %v337_v25 }
 0x169   : > { %399 = vst.msk [vmem:[%s1018_s6 + $0x8] sm:$0xff] %vm397_vm4, %v390_v26  ;;  %400 = vst.msk [vmem:[%s1018_s6 + $0x10] sm:$0xff] %vm397_vm4, %v391_v30 }
 0x16a   : > { %v376_v31 = vmul.f32 0.11111111, %v368_v28  ;;  %v377_v35 = vmul.f32 0.11111111, %v369_v32 }
 0x16b   : > { %v352_v33 = vpop.permute.xlu1 %351  ;;  %v354_v37 = vpop.permute.xlu0 %353 }
 0x16c   : > { %v392_v4 = vsel %vm384_vm5, %v376_v31, %v975_v3  ;;  %v370_v36 = vadd.f32 %v352_v33, %v338_v29  ;;  %v393_v1 = vsel %vm383_vm3, %v377_v35, %v986_v6  ;;  %v371_v40 = vadd.f32 %v354_v37, %v339_v34 }
 0x16d   : > { %401 = vst.msk [vmem:[%s1018_s6 + $0x18] sm:$0xff] %vm397_vm4, %v392_v4  ;;  %402 = vst.msk [vmem:[%s1018_s6 + $0x20] sm:$0xff] %vm397_vm4, %v393_v1 }
 0x16e   : > { %v378_v39 = vmul.f32 0.11111111, %v370_v36  ;;  %v379_v42 = vmul.f32 0.11111111, %v371_v40 }
 0x16f   : > { %v356_v41 = vpop.permute.xlu1 %355 }
 0x170   : > { %v394_v3 = vsel %vm384_vm5, %v378_v39, %v983_v5  ;;  %v372_v43 = vadd.f32 %v356_v41, %v340_v38  ;;  %v395_v6 = vsel %vm383_vm3, %v379_v42, %v994_v8 }
 0x171   : > { %403 = vst.msk [vmem:[%s1018_s6 + $0x28] sm:$0xff] %vm397_vm4, %v394_v3  ;;  %404 = vst.msk [vmem:[%s1018_s6 + $0x30] sm:$0xff] %vm397_vm4, %v395_v6 }
 0x172   : > { %v380_v44 = vmul.f32 0.11111111, %v372_v43 }
 0x174   : > { %v396_v5 = vsel %vm384_vm5, %v380_v44, %v991_v7 }
 0x175   : > { %405 = vst.msk [vmem:[%s1018_s6 + $0x38] sm:$0xff] %vm397_vm4, %v396_v5 }
 0x176   : > { %691 = shalt.err (!%p688_p5)
}
 0x177   : > { %s692_s26 = scalar_lea.hbm %s1049_s29, 1024  ;;  %s696_s8 = scalar_lea.hbm %s1108_s2, 2048 }
 0x178   : > { %p693_p9 = scmp.ne.s32.totalorder %s1049_s29, %s692_s26  ;;  %p697_p3 = scmp.lt.u32.totalorder %s1049_s29, %s1108_s2 }
 0x179   : > { %p698_p7 = scmp.lt.u32.totalorder %s696_s8, %s692_s26  ;;  %p700_p4 = scmp.lt.u32.totalorder %s692_s26, %s1049_s29 }
 0x17a   : > { %p694_p1 = pnand %p693_p9, %p891_p10 }
 0x17b   : > { %p699_p13 = por %p698_p7, %p697_p3 }
 0x17c   : > { %p695_p2 = pneg %p694_p1 }
 0x17d   : > { %p701_p6 = por %p700_p4, %p699_p13 }
 0x17f   : > { %p702_p8 = pnand %p701_p6, %p695_p2 }
 0x181   : > { %705 = shalt.err (!%p702_p8)
}
 0x182   : > { %s775_s21 = smov 128   ;;  %s776_s6 = smov 8  }
 0x183   : > { %545 = dma.vmem_to_hbm [thread:$0]  (%p891_p10), %s1051_s4, 1024, %s1049_s29, %s407_s12, %s775_s21, %s775_s21, %s776_s6  }
 0x184 PF: > { %s438_s7 = sand.u32 1, %s744_s9   ;;  %p1126_p12 = scmp.ne.s32.totalorder %s1116_s20, 0 }
 0x185   : > { %p1127_p11 = scmp.ge.s32.totalorder %s764_s14, 2  ;;  %s439_s5 = scalar_lea.sflag [#allocation5], %s438_s7 }
 0x187   : > { %p556_p0 = pnand %p1127_p11, %p1126_p12 }
 0x189   : > { %739 = dma.done.wait (!%p556_p0), %s439_s5, 1024  }
 0x18a   : > { %741 = vsyncadd (!%p556_p0), %s439_s5, 4294966272  ;;  %s19_s14 = sadd.s32 1, %s764_s14   ;;  %s1128_s9 = smov %s748_s10 }
 0x18b   : > { %p16_p5 = scmp.ge.s32.totalorder %s19_s14, 4   ;;  %s1129_s10 = smov %s752_s11 }
 0x18c   : > { %s1130_s11 = smov %s900_s28  ;;  %s1131_s12 = smov %s760_s13 }
 0x18d   : > { %s1132_s13 = smov %s1134_s25  ;;  %18 = sbr.rel (!%p16_p5) target bundleno = 7 (0x7), region = 77 }
 0x194   :  { %444 = vsyncpa [#allocation4], 1 }
 0x195   :  { %446 = vsyncpa [#allocation4 + $0x1], 1 }
 0x196   :  { %447 = vsyncpa [#allocation7], 1 }
 0x197   :  { %448 = vsyncpa [#allocation5], 1 }
 0x198   :  { %450 = vsyncpa [#allocation5 + $0x1], 1 }

</bundles_post_ra>
